<compile_context>
chip_gen: v5e
topology: v5e:2x2
jax: 0.10.0
libtpu: 0.0.40
codegen_flags: <defaults>
</compile_context>

<pallas_src>
import jax
import jax.numpy as jnp
from jax.experimental import pallas as pl
from jax.experimental.pallas import tpu as pltpu


def _round_up(x, m):
    return (x + m - 1) // m * m


def _cdiv(a, b):
    return -(-a // b)


def _softplus(x):
    # Numerically-stable softplus, matches F.softplus (beta=1) to fp32 precision.
    return jnp.maximum(x, 0.0) + jnp.log1p(jnp.exp(-jnp.abs(x)))


def _decoder_kernel(z_ref,
                    w1_ref, b1_ref,
                    w2_ref, b2_ref,
                    w3_ref, b3_ref,
                    w4_ref, b4_ref,
                    w5_ref, b5_ref,
                    o_ref):
    def layer(x, w_ref, b_ref):
        # bf16 operands on the MXU, fp32 accumulation, fp32 bias add.
        return jnp.dot(x.astype(jnp.bfloat16), w_ref[...],
                       preferred_element_type=jnp.float32) + b_ref[...]

    # nn.Sequential(ReLU, Linear, ReLU, Linear, ReLU, Linear, ReLU, Linear,
    #               ReLU, Linear) followed by softplus.
    x = jnp.maximum(z_ref[...], 0)                          # leading ReLU (bf16)
    x = jnp.maximum(layer(x, w1_ref, b1_ref), 0.0)
    x = jnp.maximum(layer(x, w2_ref, b2_ref), 0.0)
    x = jnp.maximum(layer(x, w3_ref, b3_ref), 0.0)
    x = jnp.maximum(layer(x, w4_ref, b4_ref), 0.0)
    x = layer(x, w5_ref, b5_ref)
    o_ref[...] = _softplus(x)


def _choose_batch_tile(B, *, tb_max=2048, megacore_threshold=512):
    """Batch tile in rows: multiple of 16 (bf16 sublane pack), covers B with
    < 16 rows of padding, capped at tb_max, and with an even step count (>=2)
    whenever there is enough work to share across both v7x TensorCores."""
    n_steps = max(1, _cdiv(B, tb_max))
    if B >= megacore_threshold:
        if n_steps < 2:
            n_steps = 2
        elif n_steps % 2:
            n_steps += 1
    return _round_up(_cdiv(B, n_steps), 16)


@jax.jit
def vae_decoder_forward(z, kparams):
    """z: [B, latent_dim] float32. kparams: output of prepare_kernel_params."""
    B, latent_dim = z.shape
    out_dim = kparams["w5"].shape[1]          # == input_dim (no lane padding)
    hidden_pad = kparams["w1"].shape[1]

    TB = _choose_batch_tile(B)
    B_pad = _round_up(B, TB)

    # Single bf16 cast in the wrapper (halves z DMA bytes); pad after the cast.
    z = z.astype(jnp.bfloat16)
    if B_pad != B:
        z = jnp.pad(z, ((0, B_pad - B), (0, 0)))

    weights = (kparams["w1"], kparams["b1"], kparams["w2"], kparams["b2"],
               kparams["w3"], kparams["b3"], kparams["w4"], kparams["b4"],
               kparams["w5"], kparams["b5"])

    def resident(arr):
        # Constant block index => stays VMEM-resident across the batch grid.
        return pl.BlockSpec(arr.shape, lambda i: (0, 0))

    # VMEM budget: resident weights + double-buffered z/out tiles + generous
    # activation headroom. Floor 8 MiB, cap 32 MiB (safe on v7x's 64 MiB VMEM).
    weight_bytes = sum(int(a.size) * a.dtype.itemsize for a in weights)
    tile_bytes = 2 * TB * (latent_dim * 2 + out_dim * 4)
    act_bytes = 4 * TB * hidden_pad * 4
    vmem_limit = int(min(max(weight_bytes + tile_bytes + act_bytes + (4 << 20),
                             8 << 20), 32 << 20))

    out = pl.pallas_call(
        _decoder_kernel,
        out_shape=jax.ShapeDtypeStruct((B_pad, out_dim), jnp.float32),
        grid=(B_pad // TB,),
        in_specs=[pl.BlockSpec((TB, latent_dim), lambda i: (i, 0))]
                 + [resident(w) for w in weights],
        out_specs=pl.BlockSpec((TB, out_dim), lambda i: (i, 0)),
        compiler_params=pltpu.CompilerParams(
            dimension_semantics=("parallel",),   # 2-TC sharding on v7x
            vmem_limit_bytes=vmem_limit),
    )(z, *weights)

    return out[:B] if B_pad != B else out


def init_params(key, input_dim, hidden_dim, latent_dim):
    """Deterministic synthetic fp32 params. Weights stored as [in, out]
    (pre-transposed relative to PyTorch's [out, in]); biases as [1, out]."""
    dims = [(latent_dim, hidden_dim),
            (hidden_dim, hidden_dim),
            (hidden_dim, hidden_dim),
            (hidden_dim, hidden_dim),
            (hidden_dim, input_dim)]
    params = {}
    for i, (fan_in, fan_out) in enumerate(dims, start=1):
        key, kw, kb = jax.random.split(key, 3)
        bound = 1.0 / float(fan_in) ** 0.5
        params[f"w{i}"] = jax.random.uniform(
            kw, (fan_in, fan_out), jnp.float32, minval=-bound, maxval=bound)
        params[f"b{i}"] = jax.random.uniform(
            kb, (1, fan_out), jnp.float32, minval=-bound, maxval=bound)
    return params


def prepare_kernel_params(params):
    """One-time prep (outside jit):
      * zero-pad hidden_dim to a multiple of 128 (exact: zero columns -> zero
        activations -> zero contributions through ReLU and the next matmul),
      * cast weights to bf16 (MXU-native), keep biases fp32.
    The final output feature dim is left UNPADDED so the store / out_shape are
    exactly [B, input_dim] (no oversized writeback, no post-kernel slice)."""
    hidden_dim = params["w1"].shape[1]
    hidden_pad = _round_up(hidden_dim, 128)
    ph = hidden_pad - hidden_dim

    kp = {}
    kp["w1"] = jnp.pad(params["w1"], ((0, 0), (0, ph))).astype(jnp.bfloat16)
    kp["b1"] = jnp.pad(params["b1"], ((0, 0), (0, ph))).astype(jnp.float32)
    for i in (2, 3, 4):
        kp[f"w{i}"] = jnp.pad(params[f"w{i}"],
                              ((0, ph), (0, ph))).astype(jnp.bfloat16)
        kp[f"b{i}"] = jnp.pad(params[f"b{i}"],
                              ((0, 0), (0, ph))).astype(jnp.float32)
    kp["w5"] = jnp.pad(params["w5"], ((0, ph), (0, 0))).astype(jnp.bfloat16)
    kp["b5"] = params["b5"].astype(jnp.float32)
    return kp


def _reference_forward(z, params):
    # Pure fp32 reference (matches the PyTorch module's math).
    x = jnp.maximum(z, 0.0)
    for i in range(1, 6):
        x = x @ params[f"w{i}"] + params[f"b{i}"]
        if i < 5:
            x = jnp.maximum(x, 0.0)
    return jax.nn.softplus(x)


if __name__ == "__main__":
    input_dim, hidden_dim, latent_dim = 64, 32, 16
    batch = 8

    key = jax.random.PRNGKey(0)
    key, kz = jax.random.split(key)
    z = jax.random.normal(kz, (batch, latent_dim), jnp.float32)
    params = init_params(key, input_dim, hidden_dim, latent_dim)
    kparams = prepare_kernel_params(params)

    out = vae_decoder_forward(z, kparams)
    jax.block_until_ready(out)

    ref = _reference_forward(z, params)
    assert out.shape == (batch, input_dim), out.shape
    # Kernel uses bf16 matmuls (fp32 accum), so compare with a bf16-appropriate
    # tolerance against the fp32 reference.
    assert jnp.allclose(out, ref, atol=5e-2, rtol=5e-2), float(
        jnp.max(jnp.abs(out - ref)))

    print("KERNEL_OK")
</pallas_src>

<mosaic_0001>
module attributes {stable_mosaic.version = 11 : i64} {
  func.func @_decoder_kernel(%arg0: i32, %arg1: memref<16x16xbf16, #tpu.memory_space<vmem>>, %arg2: memref<16x128xbf16, #tpu.memory_space<vmem>>, %arg3: memref<1x128xf32, #tpu.memory_space<vmem>>, %arg4: memref<128x128xbf16, #tpu.memory_space<vmem>>, %arg5: memref<1x128xf32, #tpu.memory_space<vmem>>, %arg6: memref<128x128xbf16, #tpu.memory_space<vmem>>, %arg7: memref<1x128xf32, #tpu.memory_space<vmem>>, %arg8: memref<128x128xbf16, #tpu.memory_space<vmem>>, %arg9: memref<1x128xf32, #tpu.memory_space<vmem>>, %arg10: memref<128x64xbf16, #tpu.memory_space<vmem>>, %arg11: memref<1x64xf32, #tpu.memory_space<vmem>>, %arg12: memref<16x64xf32, #tpu.memory_space<vmem>>) attributes {dimension_semantics = [#tpu.dimension_semantics<parallel>], iteration_bounds = array<i64: 1>, scalar_prefetch = 0 : i64, scratch_operands = 0 : i64, tpu.core_type = #tpu.core_type<tc>, window_params = [{transform_indices = @transform_0, window_bounds = array<i64: 16, 16>}, {pipeline_mode = #tpu.pipeline_mode<synchronous>, transform_indices = @transform_1, window_bounds = array<i64: 16, 128>}, {pipeline_mode = #tpu.pipeline_mode<synchronous>, transform_indices = @transform_2, window_bounds = array<i64: 1, 128>}, {pipeline_mode = #tpu.pipeline_mode<synchronous>, transform_indices = @transform_3, window_bounds = array<i64: 128, 128>}, {pipeline_mode = #tpu.pipeline_mode<synchronous>, transform_indices = @transform_4, window_bounds = array<i64: 1, 128>}, {pipeline_mode = #tpu.pipeline_mode<synchronous>, transform_indices = @transform_5, window_bounds = array<i64: 128, 128>}, {pipeline_mode = #tpu.pipeline_mode<synchronous>, transform_indices = @transform_6, window_bounds = array<i64: 1, 128>}, {pipeline_mode = #tpu.pipeline_mode<synchronous>, transform_indices = @transform_7, window_bounds = array<i64: 128, 128>}, {pipeline_mode = #tpu.pipeline_mode<synchronous>, transform_indices = @transform_8, window_bounds = array<i64: 1, 128>}, {pipeline_mode = #tpu.pipeline_mode<synchronous>, transform_indices = @transform_9, window_bounds = array<i64: 128, 64>}, {pipeline_mode = #tpu.pipeline_mode<synchronous>, transform_indices = @transform_10, window_bounds = array<i64: 1, 64>}, {transform_indices = @transform_11, window_bounds = array<i64: 16, 64>}]} {
    %c0 = arith.constant 0 : index
    %c0_0 = arith.constant 0 : index
    %0 = vector.load %arg1[%c0, %c0_0] : memref<16x16xbf16, #tpu.memory_space<vmem>>, vector<16x16xbf16>
    %cst = arith.constant 0.000000e+00 : bf16
    %1 = vector.broadcast %cst : bf16 to vector<16x16xbf16>
    %2 = arith.maximumf %0, %1 : vector<16x16xbf16>
    %c0_1 = arith.constant 0 : index
    %c0_2 = arith.constant 0 : index
    %3 = vector.load %arg2[%c0_1, %c0_2] : memref<16x128xbf16, #tpu.memory_space<vmem>>, vector<16x128xbf16>
    %cst_3 = arith.constant dense<0.000000e+00> : vector<16x128xf32>
    %4 = tpu.matmul %2, %3, %cst_3 {dimension_numbers = #tpu.dot_dimension_numbers<[1], [0], [0], [1], [0, 0, 1, 1], [], []>} : vector<16x16xbf16>, vector<16x128xbf16>, vector<16x128xf32> -> vector<16x128xf32>
    %c0_4 = arith.constant 0 : index
    %c0_5 = arith.constant 0 : index
    %5 = vector.load %arg3[%c0_4, %c0_5] : memref<1x128xf32, #tpu.memory_space<vmem>>, vector<1x128xf32>
    %6 = vector.broadcast %5 : vector<1x128xf32> to vector<16x128xf32>
    %7 = arith.addf %4, %6 : vector<16x128xf32>
    %cst_6 = arith.constant 0.000000e+00 : f32
    %8 = vector.broadcast %cst_6 : f32 to vector<16x128xf32>
    %9 = arith.maximumf %7, %8 : vector<16x128xf32>
    %10 = arith.truncf %9 : vector<16x128xf32> to vector<16x128xbf16>
    %c0_7 = arith.constant 0 : index
    %c0_8 = arith.constant 0 : index
    %11 = vector.load %arg4[%c0_7, %c0_8] : memref<128x128xbf16, #tpu.memory_space<vmem>>, vector<128x128xbf16>
    %cst_9 = arith.constant dense<0.000000e+00> : vector<16x128xf32>
    %12 = tpu.matmul %10, %11, %cst_9 {dimension_numbers = #tpu.dot_dimension_numbers<[1], [0], [0], [1], [0, 0, 1, 1], [], []>} : vector<16x128xbf16>, vector<128x128xbf16>, vector<16x128xf32> -> vector<16x128xf32>
    %c0_10 = arith.constant 0 : index
    %c0_11 = arith.constant 0 : index
    %13 = vector.load %arg5[%c0_10, %c0_11] : memref<1x128xf32, #tpu.memory_space<vmem>>, vector<1x128xf32>
    %14 = vector.broadcast %13 : vector<1x128xf32> to vector<16x128xf32>
    %15 = arith.addf %12, %14 : vector<16x128xf32>
    %cst_12 = arith.constant 0.000000e+00 : f32
    %16 = vector.broadcast %cst_12 : f32 to vector<16x128xf32>
    %17 = arith.maximumf %15, %16 : vector<16x128xf32>
    %18 = arith.truncf %17 : vector<16x128xf32> to vector<16x128xbf16>
    %c0_13 = arith.constant 0 : index
    %c0_14 = arith.constant 0 : index
    %19 = vector.load %arg6[%c0_13, %c0_14] : memref<128x128xbf16, #tpu.memory_space<vmem>>, vector<128x128xbf16>
    %cst_15 = arith.constant dense<0.000000e+00> : vector<16x128xf32>
    %20 = tpu.matmul %18, %19, %cst_15 {dimension_numbers = #tpu.dot_dimension_numbers<[1], [0], [0], [1], [0, 0, 1, 1], [], []>} : vector<16x128xbf16>, vector<128x128xbf16>, vector<16x128xf32> -> vector<16x128xf32>
    %c0_16 = arith.constant 0 : index
    %c0_17 = arith.constant 0 : index
    %21 = vector.load %arg7[%c0_16, %c0_17] : memref<1x128xf32, #tpu.memory_space<vmem>>, vector<1x128xf32>
    %22 = vector.broadcast %21 : vector<1x128xf32> to vector<16x128xf32>
    %23 = arith.addf %20, %22 : vector<16x128xf32>
    %cst_18 = arith.constant 0.000000e+00 : f32
    %24 = vector.broadcast %cst_18 : f32 to vector<16x128xf32>
    %25 = arith.maximumf %23, %24 : vector<16x128xf32>
    %26 = arith.truncf %25 : vector<16x128xf32> to vector<16x128xbf16>
    %c0_19 = arith.constant 0 : index
    %c0_20 = arith.constant 0 : index
    %27 = vector.load %arg8[%c0_19, %c0_20] : memref<128x128xbf16, #tpu.memory_space<vmem>>, vector<128x128xbf16>
    %cst_21 = arith.constant dense<0.000000e+00> : vector<16x128xf32>
    %28 = tpu.matmul %26, %27, %cst_21 {dimension_numbers = #tpu.dot_dimension_numbers<[1], [0], [0], [1], [0, 0, 1, 1], [], []>} : vector<16x128xbf16>, vector<128x128xbf16>, vector<16x128xf32> -> vector<16x128xf32>
    %c0_22 = arith.constant 0 : index
    %c0_23 = arith.constant 0 : index
    %29 = vector.load %arg9[%c0_22, %c0_23] : memref<1x128xf32, #tpu.memory_space<vmem>>, vector<1x128xf32>
    %30 = vector.broadcast %29 : vector<1x128xf32> to vector<16x128xf32>
    %31 = arith.addf %28, %30 : vector<16x128xf32>
    %cst_24 = arith.constant 0.000000e+00 : f32
    %32 = vector.broadcast %cst_24 : f32 to vector<16x128xf32>
    %33 = arith.maximumf %31, %32 : vector<16x128xf32>
    %34 = arith.truncf %33 : vector<16x128xf32> to vector<16x128xbf16>
    %c0_25 = arith.constant 0 : index
    %c0_26 = arith.constant 0 : index
    %35 = vector.load %arg10[%c0_25, %c0_26] : memref<128x64xbf16, #tpu.memory_space<vmem>>, vector<128x64xbf16>
    %cst_27 = arith.constant dense<0.000000e+00> : vector<16x64xf32>
    %36 = tpu.matmul %34, %35, %cst_27 {dimension_numbers = #tpu.dot_dimension_numbers<[1], [0], [0], [1], [0, 0, 1, 1], [], []>} : vector<16x128xbf16>, vector<128x64xbf16>, vector<16x64xf32> -> vector<16x64xf32>
    %c0_28 = arith.constant 0 : index
    %c0_29 = arith.constant 0 : index
    %37 = vector.load %arg11[%c0_28, %c0_29] : memref<1x64xf32, #tpu.memory_space<vmem>>, vector<1x64xf32>
    %38 = vector.broadcast %37 : vector<1x64xf32> to vector<16x64xf32>
    %39 = arith.addf %36, %38 : vector<16x64xf32>
    %cst_30 = arith.constant 0.000000e+00 : f32
    %40 = vector.broadcast %cst_30 : f32 to vector<16x64xf32>
    %41 = arith.maximumf %39, %40 : vector<16x64xf32>
    %42 = math.absf %39 : vector<16x64xf32>
    %cst_31 = arith.constant 0.000000e+00 : f32
    %43 = vector.broadcast %cst_31 : f32 to vector<16x64xf32>
    %44 = arith.subf %43, %42 : vector<16x64xf32>
    %45 = math.exp %44 : vector<16x64xf32>
    %46 = math.log1p %45 : vector<16x64xf32>
    %47 = arith.addf %41, %46 : vector<16x64xf32>
    %c0_32 = arith.constant 0 : index
    %c0_33 = arith.constant 0 : index
    %48 = vector.load %arg12[%c0_32, %c0_33] : memref<16x64xf32, #tpu.memory_space<vmem>>, vector<16x64xf32>
    tpu.vector_store %arg12[%c0_32, %c0_33], %47 {strides = array<i32>} : memref<16x64xf32, #tpu.memory_space<vmem>>, vector<16x64xf32>,
    return
  }
  func.func @transform_0(%arg0: i32) -> (i32, i32) {
    %c0_i32 = arith.constant 0 : i32
    %c0_i32_0 = arith.constant 0 : i32
    return %arg0, %c0_i32 : i32, i32
  }
  func.func @transform_1(%arg0: i32) -> (i32, i32) {
    %c0_i32 = arith.constant 0 : i32
    %c0_i32_0 = arith.constant 0 : i32
    %c0_i32_1 = arith.constant 0 : i32
    return %c0_i32, %c0_i32_0 : i32, i32
  }
  func.func @transform_2(%arg0: i32) -> (i32, i32) {
    %c0_i32 = arith.constant 0 : i32
    %c0_i32_0 = arith.constant 0 : i32
    %c0_i32_1 = arith.constant 0 : i32
    return %c0_i32, %c0_i32_0 : i32, i32
  }
  func.func @transform_3(%arg0: i32) -> (i32, i32) {
    %c0_i32 = arith.constant 0 : i32
    %c0_i32_0 = arith.constant 0 : i32
    %c0_i32_1 = arith.constant 0 : i32
    return %c0_i32, %c0_i32_0 : i32, i32
  }
  func.func @transform_4(%arg0: i32) -> (i32, i32) {
    %c0_i32 = arith.constant 0 : i32
    %c0_i32_0 = arith.constant 0 : i32
    %c0_i32_1 = arith.constant 0 : i32
    return %c0_i32, %c0_i32_0 : i32, i32
  }
  func.func @transform_5(%arg0: i32) -> (i32, i32) {
    %c0_i32 = arith.constant 0 : i32
    %c0_i32_0 = arith.constant 0 : i32
    %c0_i32_1 = arith.constant 0 : i32
    return %c0_i32, %c0_i32_0 : i32, i32
  }
  func.func @transform_6(%arg0: i32) -> (i32, i32) {
    %c0_i32 = arith.constant 0 : i32
    %c0_i32_0 = arith.constant 0 : i32
    %c0_i32_1 = arith.constant 0 : i32
    return %c0_i32, %c0_i32_0 : i32, i32
  }
  func.func @transform_7(%arg0: i32) -> (i32, i32) {
    %c0_i32 = arith.constant 0 : i32
    %c0_i32_0 = arith.constant 0 : i32
    %c0_i32_1 = arith.constant 0 : i32
    return %c0_i32, %c0_i32_0 : i32, i32
  }
  func.func @transform_8(%arg0: i32) -> (i32, i32) {
    %c0_i32 = arith.constant 0 : i32
    %c0_i32_0 = arith.constant 0 : i32
    %c0_i32_1 = arith.constant 0 : i32
    return %c0_i32, %c0_i32_0 : i32, i32
  }
  func.func @transform_9(%arg0: i32) -> (i32, i32) {
    %c0_i32 = arith.constant 0 : i32
    %c0_i32_0 = arith.constant 0 : i32
    %c0_i32_1 = arith.constant 0 : i32
    return %c0_i32, %c0_i32_0 : i32, i32
  }
  func.func @transform_10(%arg0: i32) -> (i32, i32) {
    %c0_i32 = arith.constant 0 : i32
    %c0_i32_0 = arith.constant 0 : i32
    %c0_i32_1 = arith.constant 0 : i32
    return %c0_i32, %c0_i32_0 : i32, i32
  }
  func.func @transform_11(%arg0: i32) -> (i32, i32) {
    %c0_i32 = arith.constant 0 : i32
    %c0_i32_0 = arith.constant 0 : i32
    return %arg0, %c0_i32 : i32, i32
  }
}

</mosaic_0001>

<bundles_post_ra>
// kernel: vae_decoder_forward.1
= control target key start
LH: loop header
LB: loop body
LE: loop exit
PB: predicated region body
PF: predicated region fallthrough
CT: control target
= control target key end

     0   :  { %16 = vsyncpa [#allocation3], 0  ;;  %s871_s0 = inlined_call_operand.vmem [shape: bf16[16,16], index: 0, kind: input, shape index: {}]   ;;  %s872_s1 = inlined_call_operand.vmem [shape: bf16[16,128], index: 1, kind: input, shape index: {}]   ;;  %s873_s2 = inlined_call_operand.vmem [shape: f32[1,128], index: 2, kind: input, shape index: {}]   ;;  %s874_s3 = inlined_call_operand.vmem [shape: bf16[128,128], index: 3, kind: input, shape index: {}]   ;;  %s875_s4 = inlined_call_operand.vmem [shape: f32[1,128], index: 4, kind: input, shape index: {}]   ;;  %s876_s5 = inlined_call_operand.hbm [shape: bf16[128,128], index: 5, kind: input, shape index: {}]   ;;  %s877_s6 = inlined_call_operand.vmem [shape: f32[1,128], index: 6, kind: input, shape index: {}]   ;;  %s878_s7 = inlined_call_operand.hbm [shape: bf16[128,128], index: 7, kind: input, shape index: {}]   ;;  %s879_s8 = inlined_call_operand.vmem [shape: f32[1,128], index: 8, kind: input, shape index: {}]   ;;  %s880_s9 = inlined_call_operand.vmem [shape: bf16[128,64], index: 9, kind: input, shape index: {}]   ;;  %s881_s10 = inlined_call_operand.vmem [shape: f32[1,64], index: 10, kind: input, shape index: {}]   ;;  %s882_s11 = inlined_call_operand.vmem [shape: f32[16,64], index: 11, kind: output, shape index: {}]  }
   0x1   :  { %s32_s19 = sshll.u32 %s876_s5, 4  ;;  %s33_s19 = int_to_ptr.hbm [resolvable:$true] %s32_s19 }
   0x2   :  { %17 = vsyncpa [#allocation5], 0  ;;  %s726_s20 = smov [#allocation2]   ;;  %s47_s24 = sshll.u32 %s878_s7, 4  ;;  %s48_s24 = int_to_ptr.hbm [resolvable:$true] %s47_s24 }
   0x3   :  { %s34_s21 = sshll.u32 %s726_s20, 4  ;;  %s727_s25 = smov 64   ;;  %s35_s21 = int_to_ptr.vmem [resolvable:$true] %s34_s21 }
   0x4   :  { %s728_s26 = smov 4   ;;  %s729_s27 = smov [#allocation4]  }
   0x5   :  { %40 = dma.hbm_to_vmem [thread:$0]  %s33_s19, 1024, %s35_s21, [#allocation3], %s727_s25, %s727_s25, %s728_s26  }
   0x6   :  { %s49_s28 = sshll.u32 %s729_s27, 4  ;;  %s50_s28 = int_to_ptr.vmem [resolvable:$true] %s49_s28 }
   0x7   :  { %55 = dma.hbm_to_vmem [thread:$0]  %s48_s24, 1024, %s50_s28, [#allocation5], %s727_s25, %s727_s25, %s728_s26  }
   0x8   :  { %722 = dma.done.wait [#allocation3], 1024  }
   0x9   :  { %723 = vsyncadd [#allocation3], 4294966272 }
   0xa   :  { %724 = dma.done.wait [#allocation5], 1024  }
   0xb   :  { %725 = vsyncadd [#allocation5], 4294966272  ;;  %v620_v0 = vld [vmem:[%s872_s1] sm:$0xff]  ;;  %v628_v2 = vld [vmem:[%s874_s3 + $0x38] sm:$0xff]  ;;  %vm90_vm0 = vcmask 130048   ;;  %vm478_vm2 = vcmask 523264  }
   0xc   :  { %v654_v1 = vld [vmem:[%s871_s0] sm:$0xff]   ;;  %101 = vmatpush.bf16.msra.mxu0 %v620_v0  ;;  %179 = vmatpush.bf16.msra.mxu1 %v628_v2  ;;  %v627_v5 = vld [vmem:[%s874_s3 + $0x30] sm:$0xff]  ;;  %v626_v9 = vld [vmem:[%s874_s3 + $0x28] sm:$0xff] }
   0xd   :  { %v655_v3 = vunpack.c.l.bf16 %v654_v1  ;;  %v656_v4 = vunpack.c.h.bf16 %v654_v1  ;;  %v625_v10 = vld [vmem:[%s874_s3 + $0x20] sm:$0xff]  ;;  %v624_v11 = vld [vmem:[%s874_s3 + $0x18] sm:$0xff]  ;;  %v623_v12 = vld [vmem:[%s874_s3 + $0x10] sm:$0xff] }
   0xe   :  { %v622_v13 = vld [vmem:[%s874_s3 + $0x8] sm:$0xff]  ;;  %v621_v14 = vld [vmem:[%s874_s3] sm:$0xff]  ;;  %v636_v15 = vld [vmem:[#allocation2 + $0x38] sm:$0xff] }
   0xf   :  { %v75_v6 = vmax.f32 %v655_v3, 0.0  ;;  %v76_v7 = vmax.f32 %v656_v4, 0.0  ;;  %264 = vmatpush.bf16.msra.mxu2 %v636_v15  ;;  %v635_v16 = vld [vmem:[#allocation2 + $0x30] sm:$0xff]  ;;  %v634_v17 = vld [vmem:[#allocation2 + $0x28] sm:$0xff]  ;;  %v633_v18 = vld [vmem:[#allocation2 + $0x20] sm:$0xff] }
  0x10   :  { %180 = vmatpush.bf16.msra.mxu1 %v627_v5  ;;  %v661_v20 = vld [vmem:[%s873_s2] ss:$0 sm:$0xff]  ;;  %v632_v27 = vld [vmem:[#allocation2 + $0x18] sm:$0xff]  ;;  %v631_v28 = vld [vmem:[#allocation2 + $0x10] sm:$0xff] }
  0x11   :  { %v77_v8 = vpack.c.bf16 %v76_v7, %v75_v6  ;;  %v630_v29 = vld [vmem:[#allocation2 + $0x8] sm:$0xff]  ;;  %v629_v30 = vld [vmem:[#allocation2] sm:$0xff]  ;;  %v644_v31 = vld [vmem:[#allocation4 + $0x38] sm:$0xff] }
  0x12   :  { %349 = vmatpush.bf16.msra.mxu3 %v644_v31  ;;  %v643_v32 = vld [vmem:[#allocation4 + $0x30] sm:$0xff]  ;;  %v642_v33 = vld [vmem:[#allocation4 + $0x28] sm:$0xff]  ;;  %v641_v34 = vld [vmem:[#allocation4 + $0x20] sm:$0xff] }
  0x13   :  { %491 = vmatmul.msk.bf16.vlgmr.msra.gmra.mxu0 %vm90_vm0, %v77_v8  ;;  %265 = vmatpush.bf16.msra.mxu2 %v635_v16  ;;  %v662_v36 = vld [vmem:[%s875_s4] ss:$0 sm:$0xff]  ;;  %v640_v43 = vld [vmem:[#allocation4 + $0x18] sm:$0xff]  ;;  %v639_v44 = vld [vmem:[#allocation4 + $0x10] sm:$0xff] }
  0x14   :  { %181 = vmatpush.bf16.msra.mxu1 %v626_v9  ;;  %v638_v45 = vld [vmem:[#allocation4 + $0x8] sm:$0xff]  ;;  %v637_v46 = vld [vmem:[#allocation4] sm:$0xff]  ;;  %v652_v47 = vld [vmem:[%s880_s9 + $0x38] sm:$0xff] }
  0x15   :  { %434 = vmatpush.bf16.msrb.mxu0 %v652_v47  ;;  %v651_v48 = vld [vmem:[%s880_s9 + $0x30] sm:$0xff]  ;;  %v650_v49 = vld [vmem:[%s880_s9 + $0x28] sm:$0xff]  ;;  %v649_v50 = vld [vmem:[%s880_s9 + $0x20] sm:$0xff] }
  0x16   :  { %350 = vmatpush.bf16.msra.mxu3 %v643_v32  ;;  %v663_v52 = vld [vmem:[%s877_s6] ss:$0 sm:$0xff]  ;;  %v648_v59 = vld [vmem:[%s880_s9 + $0x18] sm:$0xff]  ;;  %v647_v60 = vld [vmem:[%s880_s9 + $0x10] sm:$0xff] }
  0x17   :  { %266 = vmatpush.bf16.msra.mxu2 %v634_v17  ;;  %v646_v61 = vld [vmem:[%s880_s9 + $0x8] sm:$0xff]  ;;  %v645_v62 = vld [vmem:[%s880_s9] sm:$0xff] }
  0x18   :  { %182 = vmatpush.bf16.msra.mxu1 %v625_v10  ;;  %v664_v0 = vld [vmem:[%s879_s8] ss:$0 sm:$0xff] }
  0x19   :  { %435 = vmatpush.bf16.msrb.mxu0 %v651_v48  ;;  %v665_v7 = vld [vmem:[%s881_s10] ss:$0 sm:$0xff] }
  0x1a   :  { %351 = vmatpush.bf16.msra.mxu3 %v642_v33 }
  0x1b   :  { %267 = vmatpush.bf16.msra.mxu2 %v633_v18 }
  0x1c   :  { %183 = vmatpush.bf16.msra.mxu1 %v624_v11 }
  0x1d   :  { %436 = vmatpush.bf16.msrb.mxu0 %v650_v49 }
  0x1e   :  { %352 = vmatpush.bf16.msra.mxu3 %v641_v34 }
  0x1f   :  { %268 = vmatpush.bf16.msra.mxu2 %v632_v27 }
  0x20   :  { %184 = vmatpush.bf16.msra.mxu1 %v623_v12 }
  0x21   :  { %437 = vmatpush.bf16.msrb.mxu0 %v649_v50 }
  0x22   :  { %353 = vmatpush.bf16.msra.mxu3 %v640_v43 }
  0x23   :  { %269 = vmatpush.bf16.msra.mxu2 %v631_v28 }
  0x24   :  { %185 = vmatpush.bf16.msra.mxu1 %v622_v13 }
  0x25   :  { %438 = vmatpush.bf16.msrb.mxu0 %v648_v59 }
  0x26   :  { %354 = vmatpush.bf16.msra.mxu3 %v639_v44 }
  0x27   :  { %270 = vmatpush.bf16.msra.mxu2 %v630_v29 }
  0x28   :  { %186 = vmatpush.bf16.msra.mxu1 %v621_v14 }
  0x29   :  { %439 = vmatpush.bf16.msrb.mxu0 %v647_v60 }
  0x2a   :  { %355 = vmatpush.bf16.msra.mxu3 %v638_v45 }
  0x2b   :  { %271 = vmatpush.bf16.msra.mxu2 %v629_v30 }
  0x2d   :  { %440 = vmatpush.bf16.msrb.mxu0 %v646_v61 }
  0x2e   :  { %356 = vmatpush.bf16.msra.mxu3 %v637_v46 }
  0x31   :  { %441 = vmatpush.bf16.msrb.mxu0 %v645_v62 }
  0x90   :  { %v103_v19 = vpop.f32.mrf.mxu0 }
  0x91   :  { %v104_v21 = vadd.f32 %v661_v20, %v103_v19 }
  0x93   :  { %v108_v24 = vmax.f32 %v104_v21, 0.0 }
  0x98   :  { %v105_v22 = vpop.f32.mrf.mxu0 }
  0x99   :  { %v106_v23 = vadd.f32 %v661_v20, %v105_v22 }
  0x9b   :  { %v109_v25 = vmax.f32 %v106_v23, 0.0 }
  0x9d   :  { %v110_v26 = vpack.c.bf16 %v109_v25, %v108_v24 }
  0x9f   :  { %187 = vmatmul.bf16.vlgmr.msra.gmra.mxu1 %v110_v26 }
 0x11c   :  { %v188_v35 = vpop.f32.mrf.mxu1 }
 0x11d   :  { %v189_v37 = vadd.f32 %v662_v36, %v188_v35 }
 0x11f   :  { %v193_v40 = vmax.f32 %v189_v37, 0.0 }
 0x124   :  { %v190_v38 = vpop.f32.mrf.mxu1 }
 0x125   :  { %v191_v39 = vadd.f32 %v662_v36, %v190_v38 }
 0x127   :  { %v194_v41 = vmax.f32 %v191_v39, 0.0 }
 0x129   :  { %v195_v42 = vpack.c.bf16 %v194_v41, %v193_v40 }
 0x12b   :  { %272 = vmatmul.bf16.vlgmr.msra.gmra.mxu2 %v195_v42 }
 0x1ae   :  { %v273_v51 = vpop.f32.mrf.mxu2 }
 0x1af   :  { %v274_v53 = vadd.f32 %v663_v52, %v273_v51 }
 0x1b1   :  { %v278_v56 = vmax.f32 %v274_v53, 0.0 }
 0x1b6   :  { %v275_v54 = vpop.f32.mrf.mxu2 }
 0x1b7   :  { %v276_v55 = vadd.f32 %v663_v52, %v275_v54 }
 0x1b9   :  { %v279_v57 = vmax.f32 %v276_v55, 0.0 }
 0x1bb   :  { %v280_v58 = vpack.c.bf16 %v279_v57, %v278_v56 }
 0x1bd   :  { %357 = vmatmul.bf16.vlgmr.msra.gmra.mxu3 %v280_v58 }
 0x240   :  { %v358_v63 = vpop.f32.mrf.mxu3 }
 0x241   :  { %v359_v1 = vadd.f32 %v664_v0, %v358_v63 }
 0x243   :  { %v363_v4 = vmax.f32 %v359_v1, 0.0 }
 0x248   :  { %v360_v2 = vpop.f32.mrf.mxu3 }
 0x249   :  { %v361_v3 = vadd.f32 %v664_v0, %v360_v2 }
 0x24b   :  { %v364_v5 = vmax.f32 %v361_v3, 0.0 }
 0x24d   :  { %v365_v6 = vpack.c.bf16 %v364_v5, %v363_v4 }
 0x24f   :  { %442 = vmatmul.bf16.vlgmr.msrb.gmra.mxu0 %v365_v6 }
 0x2cc   :  { %v443_v8 = vpop.f32.mrf.mxu0 }
 0x2cd   :  { %v444_v9 = vadd.f32 %v665_v7, %v443_v8 }
 0x2cf   :  { %v450_v10 = vand.u32 2147483647, %v444_v9  ;;  %v448_v29 = vmax.f32 %v444_v9, 0.0 }
 0x2d1   :  { %v452_v11 = vsub.f32 0.0, %v450_v10 }
 0x2d3   :  { %v454_v12 = vmul.f32 1.442695, %v452_v11 }
 0x2d4   :  { %v445_v13 = vpop.f32.mrf.mxu0 }
 0x2d5   :  { %666 = vpow2.f32 %v454_v12  ;;  %v446_v14 = vadd.f32 %v665_v7, %v445_v13 }
 0x2d7   :  { %v451_v15 = vand.u32 2147483647, %v446_v14  ;;  %v449_v37 = vmax.f32 %v446_v14, 0.0 }
 0x2d9   :  { %v453_v16 = vsub.f32 0.0, %v451_v15 }
 0x2db   :  { %v667_v17 = vpop.eup %666  ;;  %v456_v18 = vmul.f32 1.442695, %v453_v16 }
 0x2dc   :  { %v458_v19 = vadd.f32 1.0, %v667_v17  ;;  %v461_v20 = vmul.f32 -0.5, %v667_v17  ;;  %v464_v22 = vand.u32 2147483647, %v667_v17 }
 0x2dd   :  { %668 = vpow2.f32 %v456_v18 }
 0x2de   :  { %670 = vlog2.f32 %v458_v19  ;;  %v462_v21 = vadd.f32 1.0, %v461_v20  ;;  %vm465_vm1 = vcmp.lt.f32.partialorder %v464_v22, 0.0004427343 }
 0x2e0   :  { %v463_v27 = vmul.f32 %v667_v17, %v462_v21 }
 0x2e3   :  { %v669_v23 = vpop.eup %668 }
 0x2e4   :  { %v671_v24 = vpop.eup %670  ;;  %v467_v25 = vadd.f32 1.0, %v669_v23  ;;  %v470_v28 = vmul.f32 -0.5, %v669_v23  ;;  %v473_v33 = vand.u32 2147483647, %v669_v23 }
 0x2e5   :  { %v460_v26 = vmul.f32 0.6931472, %v671_v24 }
 0x2e6   :  { %672 = vlog2.f32 %v467_v25  ;;  %v471_v32 = vadd.f32 1.0, %v470_v28  ;;  %vm474_vm3 = vcmp.lt.f32.partialorder %v473_v33, 0.0004427343 }
 0x2e7   :  { %v466_v30 = vsel %vm465_vm1, %v463_v27, %v460_v26 }
 0x2e8   :  { %v476_v31 = vadd.f32 %v466_v30, %v448_v29  ;;  %v472_v36 = vmul.f32 %v669_v23, %v471_v32 }
 0x2ea   :  { %479 = vst.msk [vmem:[%s882_s11] sm:$0xff] %vm478_vm2, %v476_v31 }
 0x2ec   :  { %v673_v34 = vpop.eup %672 }
 0x2ed   :  { %v469_v35 = vmul.f32 0.6931472, %v673_v34 }
 0x2ef   :  { %v475_v38 = vsel %vm474_vm3, %v472_v36, %v469_v35 }
 0x2f0   :  { %v477_v39 = vadd.f32 %v475_v38, %v449_v37 }
 0x2f2   :  { %480 = vst.msk [vmem:[%s882_s11 + $0x8] sm:$0xff] %vm478_vm2, %v477_v39 }
 0x2f3   :  { %485 = vsyncpa [#allocation3], 1 }
 0x2f4   :  { %486 = vsyncpa [#allocation5], 1 }

</bundles_post_ra>
